<compile_context>
chip_gen: v5e
topology: v5e:2x2
jax: 0.10.0
libtpu: 0.0.40
codegen_flags: <defaults>
</compile_context>

<pallas_src>
import functools

import jax
import jax.numpy as jnp
from jax.experimental import pallas as pl
from jax.experimental.pallas import tpu as pltpu

INPUT_SIZE = 400
OUTPUT_SIZE = 10


def _round_up(n, m):
    return ((n + m - 1) // m) * m


def _linear_kernel(x_ref, w_ref, b_ref, o_ref, *, compute_dtype):
    # x_ref: (TM, INPUT_SIZE) f32        -- streamed per grid step
    # w_ref: (INPUT_SIZE, OUTPUT_SIZE)   -- compute dtype, VMEM-resident
    # b_ref: (1, OUTPUT_SIZE) f32        -- VMEM-resident
    # o_ref: (TM, OUTPUT_SIZE) f32
    x = x_ref[...].astype(compute_dtype)  # in-vreg cast, no extra HBM pass
    acc = jnp.dot(x, w_ref[...], preferred_element_type=jnp.float32)
    o_ref[...] = (acc + b_ref[...]).astype(o_ref.dtype)


def _choose_batch_tile(B, block_b):
    """Batch tile: multiple of 8 sublanes (16 / 256 as B grows), capped at block_b."""
    if B >= block_b:
        tm = block_b
    elif B > 256:
        tm = _round_up(B, 256)
    elif B > 16:
        tm = _round_up(B, 16)
    else:
        tm = _round_up(max(B, 1), 8)
    # Keep >= 2 grid steps for larger batches so the "parallel" axis can shard
    # across v7x's two TensorCores (neutral on single-TC v5e / v6e).
    if B > 512 and pl.cdiv(B, tm) < 2:
        tm = _round_up(pl.cdiv(B, 2), 256)
    return tm


def logistic_regression_multi(x, w, b, *, block_b=4096, use_bf16=True):
    """Forward pass matching PyTorch nn.Linear: out = x @ w.T + b.

    x: (B, INPUT_SIZE) float32
    w: (OUTPUT_SIZE, INPUT_SIZE) float32  (nn.Linear weight layout)
    b: (OUTPUT_SIZE,) float32
    returns (B, OUTPUT_SIZE) float32
    """
    B = x.shape[0]
    compute_dtype = jnp.bfloat16 if use_bf16 else jnp.float32

    # Weight / bias prep is tiny (400x10); x itself is never copied host-side.
    w_t = w.T.astype(compute_dtype)                      # (INPUT_SIZE, OUTPUT_SIZE)
    b2d = b.reshape(1, OUTPUT_SIZE).astype(jnp.float32)  # (1, OUTPUT_SIZE)

    block_b = max(8, _round_up(block_b, 8))
    tm = _choose_batch_tile(B, block_b)
    grid = (pl.cdiv(B, tm),)  # ragged last tile handled by Pallas; no pad/slice

    cost = pl.CostEstimate(
        flops=2 * B * INPUT_SIZE * OUTPUT_SIZE,
        transcendentals=0,
        bytes_accessed=(B * INPUT_SIZE * x.dtype.itemsize            # x read (f32)
                        + INPUT_SIZE * OUTPUT_SIZE * w_t.dtype.itemsize
                        + OUTPUT_SIZE * 4                            # bias read
                        + B * OUTPUT_SIZE * 4),                      # out write
    )

    kernel = functools.partial(_linear_kernel, compute_dtype=compute_dtype)

    return pl.pallas_call(
        kernel,
        out_shape=jax.ShapeDtypeStruct((B, OUTPUT_SIZE), jnp.float32),
        grid_spec=pltpu.PrefetchScalarGridSpec(
            num_scalar_prefetch=0,
            grid=grid,
            in_specs=[
                # x streams tile-by-tile along the batch axis (double-buffered).
                pl.BlockSpec((tm, INPUT_SIZE), lambda i: (i, 0)),
                # Weight and bias stay resident in VMEM (same block every step).
                pl.BlockSpec((INPUT_SIZE, OUTPUT_SIZE), lambda i: (0, 0)),
                pl.BlockSpec((1, OUTPUT_SIZE), lambda i: (0, 0)),
            ],
            out_specs=pl.BlockSpec((tm, OUTPUT_SIZE), lambda i: (i, 0)),
        ),
        compiler_params=pltpu.CompilerParams(
            dimension_semantics=("parallel",),
            # f32 x tiles at tm=4096 need ~20 MiB double-buffered; raise the
            # scoped-VMEM limit so large tiles fit on v5e (16 MiB default) and
            # stay well within v7x's 64 MiB physical VMEM per TensorCore.
            vmem_limit_bytes=48 << 20,
        ),
        cost_estimate=cost,
    )(x, w_t, b2d)


if __name__ == "__main__":
    key = jax.random.PRNGKey(0)
    kx1, kx2, kx3, kw, kb = jax.random.split(key, 5)

    # Deterministic parameter init mimicking nn.Linear's U(-1/sqrt(in), 1/sqrt(in)).
    bound = 1.0 / (INPUT_SIZE ** 0.5)
    w = jax.random.uniform(kw, (OUTPUT_SIZE, INPUT_SIZE), jnp.float32, -bound, bound)
    b = jax.random.uniform(kb, (OUTPUT_SIZE,), jnp.float32, -bound, bound)

    def ref_f32(xs):
        # High-precision f32 reference (matches PyTorch nn.Linear math).
        return jnp.dot(xs, w.T, precision=jax.lax.Precision.HIGHEST) + b

    def ref_bf16(xs):
        # Same bf16-input / f32-accumulate math as the kernel's default path.
        return (jnp.dot(xs.astype(jnp.bfloat16), w.T.astype(jnp.bfloat16),
                        preferred_element_type=jnp.float32) + b)

    # 1) Small batch, single full tile, bf16 compute path.
    x1 = jax.random.normal(kx1, (8, INPUT_SIZE), jnp.float32)
    out1 = jax.block_until_ready(logistic_regression_multi(x1, w, b))
    assert out1.shape == (8, OUTPUT_SIZE) and out1.dtype == jnp.float32
    assert jnp.allclose(out1, ref_bf16(x1), atol=1e-3, rtol=1e-3)
    assert jnp.allclose(out1, ref_f32(x1), atol=5e-2, rtol=5e-2)

    # 2) Multi-tile grid with a ragged last tile (300 = 2*128 + 44); no host pad.
    x2 = jax.random.normal(kx2, (300, INPUT_SIZE), jnp.float32)
    out2 = jax.block_until_ready(logistic_regression_multi(x2, w, b, block_b=128))
    assert out2.shape == (300, OUTPUT_SIZE)
    assert jnp.allclose(out2, ref_bf16(x2), atol=1e-3, rtol=1e-3)

    # 3) Exact f32 path (use_bf16=False), single ragged block (B=20, tile=32).
    x3 = jax.random.normal(kx3, (20, INPUT_SIZE), jnp.float32)
    out3 = jax.block_until_ready(
        logistic_regression_multi(x3, w, b, use_bf16=False))
    assert out3.shape == (20, OUTPUT_SIZE)
    # Loose-ish tolerance: MXU f32 emulation vs HIGHEST-precision reference.
    assert jnp.allclose(out3, ref_f32(x3), atol=1e-2, rtol=1e-2)

    print("KERNEL_OK")
</pallas_src>

<mosaic_0001>
module attributes {stable_mosaic.version = 11 : i64} {
  func.func @_linear_kernel(%arg0: i32, %arg1: memref<8x400xf32, #tpu.memory_space<vmem>>, %arg2: memref<400x10xbf16, #tpu.memory_space<vmem>>, %arg3: memref<1x10xf32, #tpu.memory_space<vmem>>, %arg4: memref<8x10xf32, #tpu.memory_space<vmem>>) attributes {dimension_semantics = [#tpu.dimension_semantics<parallel>], iteration_bounds = array<i64: 1>, scalar_prefetch = 0 : i64, scratch_operands = 0 : i64, tpu.core_type = #tpu.core_type<tc>, window_params = [{transform_indices = @transform_0, window_bounds = array<i64: 8, 400>}, {pipeline_mode = #tpu.pipeline_mode<synchronous>, transform_indices = @transform_1, window_bounds = array<i64: 400, 10>}, {pipeline_mode = #tpu.pipeline_mode<synchronous>, transform_indices = @transform_2, window_bounds = array<i64: 1, 10>}, {transform_indices = @transform_3, window_bounds = array<i64: 8, 10>}]} {
    %c0 = arith.constant 0 : index
    %c0_0 = arith.constant 0 : index
    %0 = vector.load %arg1[%c0, %c0_0] : memref<8x400xf32, #tpu.memory_space<vmem>>, vector<8x400xf32>
    %1 = arith.truncf %0 : vector<8x400xf32> to vector<8x400xbf16>
    %c0_1 = arith.constant 0 : index
    %c0_2 = arith.constant 0 : index
    %2 = vector.load %arg2[%c0_1, %c0_2] : memref<400x10xbf16, #tpu.memory_space<vmem>>, vector<400x10xbf16>
    %cst = arith.constant dense<0.000000e+00> : vector<8x10xf32>
    %3 = tpu.matmul %1, %2, %cst {dimension_numbers = #tpu.dot_dimension_numbers<[1], [0], [0], [1], [0, 0, 1, 1], [], []>} : vector<8x400xbf16>, vector<400x10xbf16>, vector<8x10xf32> -> vector<8x10xf32>
    %c0_3 = arith.constant 0 : index
    %c0_4 = arith.constant 0 : index
    %4 = vector.load %arg3[%c0_3, %c0_4] : memref<1x10xf32, #tpu.memory_space<vmem>>, vector<1x10xf32>
    %5 = vector.broadcast %4 : vector<1x10xf32> to vector<8x10xf32>
    %6 = arith.addf %3, %5 : vector<8x10xf32>
    %c0_5 = arith.constant 0 : index
    %c0_6 = arith.constant 0 : index
    %7 = vector.load %arg4[%c0_5, %c0_6] : memref<8x10xf32, #tpu.memory_space<vmem>>, vector<8x10xf32>
    tpu.vector_store %arg4[%c0_5, %c0_6], %6 {strides = array<i32>} : memref<8x10xf32, #tpu.memory_space<vmem>>, vector<8x10xf32>,
    return
  }
  func.func @transform_0(%arg0: i32) -> (i32, i32) {
    %c0_i32 = arith.constant 0 : i32
    %c0_i32_0 = arith.constant 0 : i32
    return %arg0, %c0_i32 : i32, i32
  }
  func.func @transform_1(%arg0: i32) -> (i32, i32) {
    %c0_i32 = arith.constant 0 : i32
    %c0_i32_0 = arith.constant 0 : i32
    %c0_i32_1 = arith.constant 0 : i32
    return %c0_i32, %c0_i32_0 : i32, i32
  }
  func.func @transform_2(%arg0: i32) -> (i32, i32) {
    %c0_i32 = arith.constant 0 : i32
    %c0_i32_0 = arith.constant 0 : i32
    %c0_i32_1 = arith.constant 0 : i32
    return %c0_i32, %c0_i32_0 : i32, i32
  }
  func.func @transform_3(%arg0: i32) -> (i32, i32) {
    %c0_i32 = arith.constant 0 : i32
    %c0_i32_0 = arith.constant 0 : i32
    return %arg0, %c0_i32 : i32, i32
  }
}

</mosaic_0001>

<bundles_post_ra>
// kernel: tpu_custom_call.1
= control target key start
LH: loop header
LB: loop body
LE: loop exit
PB: predicated region body
PF: predicated region fallthrough
CT: control target
= control target key end

     0   :  { %vm228_vm0 = vcmask 130048   ;;  %s570_s0 = inlined_call_operand.vmem [shape: f32[8,400], index: 0, kind: input, shape index: {}]   ;;  %s571_s1 = inlined_call_operand.vmem [shape: bf16[400,10], index: 1, kind: input, shape index: {}]   ;;  %s572_s2 = inlined_call_operand.vmem [shape: f32[1,10], index: 2, kind: input, shape index: {}]   ;;  %s573_s3 = inlined_call_operand.hbm [shape: f32[8,10], index: 3, kind: output, shape index: {}]  }
   0x1   :  { %v410_v0 = vld [vmem:[%s571_s1 + $0x38] sm:$0xff]  ;;  %v409_v3 = vld [vmem:[%s571_s1 + $0x30] sm:$0xff]  ;;  %v408_v6 = vld [vmem:[%s571_s1 + $0x28] sm:$0xff] }
   0x2   :  { %v418_v1 = vld [vmem:[%s571_s1 + $0x78] sm:$0xff]  ;;  %232 = vmatpush.bf16.msra.mxu0 %v410_v0  ;;  %v417_v4 = vld [vmem:[%s571_s1 + $0x70] sm:$0xff]  ;;  %v416_v7 = vld [vmem:[%s571_s1 + $0x68] sm:$0xff] }
   0x3   :  { %v426_v2 = vld [vmem:[%s571_s1 + $0xb8] sm:$0xff]  ;;  %245 = vmatpush.bf16.msra.mxu1 %v418_v1  ;;  %v425_v5 = vld [vmem:[%s571_s1 + $0xb0] sm:$0xff]  ;;  %v427_v8 = vld [vmem:[%s571_s1 + $0xc0] sm:$0xff] }
   0x4   :  { %258 = vmatpush.bf16.msra.mxu2 %v426_v2  ;;  %v19_v9 = vld [vmem:[%s570_s0 + $0x18] sm:$0xff]  ;;  %v424_v10 = vld [vmem:[%s571_s1 + $0xa8] sm:$0xff]  ;;  %278 = vmatpush.bf16.msra.mxu3 %v427_v8  ;;  %v407_v12 = vld [vmem:[%s571_s1 + $0x20] sm:$0xff] }
   0x5   :  { %v23_v11 = vpack.c.bf16 %v19_v9, %v19_v9  ;;  %v415_v13 = vld [vmem:[%s571_s1 + $0x60] sm:$0xff] }
   0x6   :  { %233 = vmatpush.bf16.msra.mxu0 %v409_v3 }
   0x7   :  { %246 = vmatpush.bf16.msra.mxu1 %v417_v4 }
   0x8   :  { %259 = vmatpush.bf16.msra.mxu2 %v425_v5 }
   0xa   :  { %234 = vmatpush.bf16.msra.mxu0 %v408_v6 }
   0xb   :  { %247 = vmatpush.bf16.msra.mxu1 %v416_v7 }
   0xc   :  { %8 = vsyncpa [#allocation3], 0  ;;  %260 = vmatpush.bf16.msra.mxu2 %v424_v10  ;;  %v423_v14 = vld [vmem:[%s571_s1 + $0xa0] sm:$0xff]  ;;  %402 = vmatmul.msk.bf16.vlgmr.msra.gmra.mxu3 %vm228_vm0, %v23_v11  ;;  %v406_v15 = vld [vmem:[%s571_s1 + $0x18] sm:$0xff]  ;;  %s293_s20 = sshll.u32 %s573_s3, 4  ;;  %vm284_vm1 = vcmask 80896   ;;  %s294_s20 = int_to_ptr.hbm [resolvable:$true] %s293_s20 }
   0xd   :  { %v414_v16 = vld [vmem:[%s571_s1 + $0x58] sm:$0xff]  ;;  %v405_v18 = vld [vmem:[%s571_s1 + $0x10] sm:$0xff]  ;;  %v404_v21 = vld [vmem:[%s571_s1 + $0x8] sm:$0xff] }
   0xe   :  { %235 = vmatpush.bf16.msra.mxu0 %v407_v12  ;;  %v422_v17 = vld [vmem:[%s571_s1 + $0x98] sm:$0xff]  ;;  %v413_v19 = vld [vmem:[%s571_s1 + $0x50] sm:$0xff]  ;;  %v412_v22 = vld [vmem:[%s571_s1 + $0x48] sm:$0xff] }
   0xf   :  { %248 = vmatpush.bf16.msra.mxu1 %v415_v13  ;;  %v421_v20 = vld [vmem:[%s571_s1 + $0x90] sm:$0xff]  ;;  %v420_v23 = vld [vmem:[%s571_s1 + $0x88] sm:$0xff]  ;;  %v403_v24 = vld [vmem:[%s571_s1] sm:$0xff] }
  0x10   :  { %261 = vmatpush.bf16.msra.mxu2 %v423_v14  ;;  %v411_v25 = vld [vmem:[%s571_s1 + $0x40] sm:$0xff]  ;;  %v17_v27 = vld [vmem:[%s570_s0 + $0x8] sm:$0xff]  ;;  %v18_v29 = vld [vmem:[%s570_s0 + $0x10] sm:$0xff] }
  0x11   :  { %v16_v26 = vld [vmem:[%s570_s0] sm:$0xff]  ;;  %v21_v31 = vpack.c.bf16 %v17_v27, %v17_v27  ;;  %v22_v32 = vpack.c.bf16 %v18_v29, %v18_v29  ;;  %s456_s0 = smov [#allocation2]  }
  0x12   :  { %236 = vmatpush.bf16.msra.mxu0 %v406_v15  ;;  %v419_v28 = vld [vmem:[%s571_s1 + $0x80] sm:$0xff]  ;;  %v20_v30 = vpack.c.bf16 %v16_v26, %v16_v26  ;;  %s291_s1 = sshll.u32 %s456_s0, 4  ;;  %s292_s1 = int_to_ptr.vmem [resolvable:$true] %s291_s1 }
  0x13   :  { %249 = vmatpush.bf16.msra.mxu1 %v414_v16  ;;  %v429_v35 = vld [vmem:[%s572_s2] ss:$0 sm:$0xff] }
  0x14   :  { %262 = vmatpush.bf16.msra.mxu2 %v422_v17 }
  0x16   :  { %237 = vmatpush.bf16.msra.mxu0 %v405_v18 }
  0x17   :  { %250 = vmatpush.bf16.msra.mxu1 %v413_v19 }
  0x18   :  { %263 = vmatpush.bf16.msra.mxu2 %v421_v20 }
  0x1a   :  { %238 = vmatpush.bf16.msra.mxu0 %v404_v21 }
  0x1b   :  { %251 = vmatpush.bf16.msra.mxu1 %v412_v22 }
  0x1c   :  { %264 = vmatpush.bf16.msra.mxu2 %v420_v23 }
  0x1e   :  { %239 = vmatpush.bf16.msra.mxu0 %v403_v24 }
  0x1f   :  { %252 = vmatpush.bf16.msra.mxu1 %v411_v25 }
  0x20   :  { %265 = vmatpush.bf16.msra.mxu2 %v419_v28 }
  0x21   :  { %240 = vmatmul.bf16.vlgmr.msra.gmra.mxu0 %v20_v30 }
  0x22   :  { %253 = vmatmul.bf16.vlgmr.msra.gmra.mxu1 %v21_v31 }
  0x23   :  { %266 = vmatmul.bf16.vlgmr.msra.gmra.mxu2 %v22_v32 }
  0x8f   :  { %v280_v33 = vpop.f32.mrf.mxu3 }
  0x97   :  { %v282_v34 = vpop.f32.mrf.mxu3 }
  0x9e   :  { %v241_v36 = vpop.f32.mrf.mxu0 }
  0x9f   :  { %v254_v37 = vpop.f32.mrf.mxu1  ;;  %v242_v38 = vadd.f32 %v429_v35, %v241_v36 }
  0xa1   :  { %v255_v39 = vadd.f32 %v254_v37, %v242_v38 }
  0xa6   :  { %v267_v40 = vpop.f32.mrf.mxu2  ;;  %v243_v42 = vpop.f32.mrf.mxu0 }
  0xa7   :  { %v268_v41 = vadd.f32 %v267_v40, %v255_v39  ;;  %v256_v43 = vpop.f32.mrf.mxu1 }
  0xa9   :  { %v281_v44 = vadd.f32 %v280_v33, %v268_v41 }
  0xab   :  { %285 = vst.msk [vmem:[#allocation2] sm:$0xff] %vm284_vm1, %v281_v44 }
  0xac   :  { %296 = dma.vmem_to_hbm [thread:$0]  %s292_s1, 128, %s294_s20, [#allocation3]  }
  0xae   :  { %v269_v45 = vpop.f32.mrf.mxu2 }
  0xaf   :  { %454 = dma.done.wait [#allocation3], 128  }
  0xb0   :  { %455 = vsyncadd [#allocation3], 4294967168 }
  0xb1   :  { %301 = vsyncpa [#allocation3], 1 }

</bundles_post_ra>
